<compile_context>
chip_gen: v7x
topology: tpu7x:2x2x1
jax: 0.10.0
libtpu: 0.0.40
codegen_flags: <defaults>
</compile_context>

<pallas_src>
import jax
import jax.numpy as jnp
from jax.experimental import pallas as pl
from jax.experimental.pallas import tpu as pltpu

LANES = 128
SUBLANES = 8
MAX_BLOCK_ROWS = 2048      # 2048 x 128 f32 = 1 MiB per input per grid step
NUM_CORES = 2              # v7x has 2 TensorCores; no-op split on v5e/v6e


def _cdiv(a, b):
    return -(-a // b)


def _round_up(a, b):
    return _cdiv(a, b) * b


def _nss_partials_kernel(sal_ref, fix_ref, acc_ref):
    """Accumulates [sum(x), sum(x*x), sum(x*mask), sum(mask)] as (8,128) partials."""
    step = pl.program_id(1)

    @pl.when(step == 0)
    def _init():
        acc_ref[...] = jnp.zeros_like(acc_ref)

    x = sal_ref[...].astype(jnp.float32)                               # (block_rows, 128)
    m = (fix_ref[...].astype(jnp.float32) > 0.5).astype(jnp.float32)   # fixation mask

    nsub = sal_ref.shape[0] // SUBLANES
    x3 = x.reshape(nsub, SUBLANES, LANES)
    m3 = m.reshape(nsub, SUBLANES, LANES)

    # Reductions over the leading (whole-vreg) axis lower to elementwise VPU adds;
    # all cross-lane/sublane work is deferred to the tiny finalize in the wrapper.
    acc_ref[0, 0, :, :] += jnp.sum(x3, axis=0)
    acc_ref[0, 1, :, :] += jnp.sum(x3 * x3, axis=0)
    acc_ref[0, 2, :, :] += jnp.sum(x3 * m3, axis=0)
    acc_ref[0, 3, :, :] += jnp.sum(m3, axis=0)


def nss_loss(sal_map, fix):
    # TODO(synk): PyTorch branch with F.interpolate when sal_map.size() != fix.size()
    # is not implemented; this kernel assumes matching shapes (the common NSS case).
    assert sal_map.shape == fix.shape, "sal_map and fix must have the same shape"

    n_total = sal_map.size
    assert n_total >= 2, "need at least 2 elements for an unbiased std"

    rows = _cdiv(n_total, LANES)
    per_core_rows = _cdiv(rows, NUM_CORES)
    block_rows = min(MAX_BLOCK_ROWS, _round_up(per_core_rows, SUBLANES))
    steps = _cdiv(rows, NUM_CORES * block_rows)
    rows_padded = NUM_CORES * block_rows * steps

    # Flatten row-major; zero-pad the ragged tail (zeros are neutral for all four
    # accumulated statistics).  Inputs keep their native dtype (no wrapper upcast).
    sal_flat = sal_map.reshape(-1)
    fix_flat = fix.reshape(-1)
    pad = rows_padded * LANES - n_total
    if pad:
        sal_flat = jnp.pad(sal_flat, (0, pad))
        fix_flat = jnp.pad(fix_flat, (0, pad))
    sal2 = sal_flat.reshape(rows_padded, LANES)
    fix2 = fix_flat.reshape(rows_padded, LANES)

    in_spec = pl.BlockSpec((block_rows, LANES), lambda c, i: (c * steps + i, 0))

    partials = pl.pallas_call(
        _nss_partials_kernel,
        out_shape=jax.ShapeDtypeStruct((NUM_CORES, 4, SUBLANES, LANES), jnp.float32),
        grid_spec=pltpu.PrefetchScalarGridSpec(
            num_scalar_prefetch=0,
            grid=(NUM_CORES, steps),
            in_specs=[in_spec, in_spec],
            out_specs=pl.BlockSpec((1, 4, SUBLANES, LANES),
                                   lambda c, i: (c, 0, 0, 0)),
        ),
        compiler_params=pltpu.CompilerParams(
            dimension_semantics=("parallel", "arbitrary")),
    )(sal2, fix2)

    # Tiny final combine (8 KiB) + normalization in plain JAX.
    sums = jnp.sum(partials, axis=(0, 2, 3))             # (4,)
    s, ss, ms, mc = sums[0], sums[1], sums[2], sums[3]
    n = jnp.float32(n_total)
    mean = s / n
    var = (ss - n * mean * mean) / (n - 1.0)              # unbiased (ddof=1), torch.std default
    std = jnp.sqrt(jnp.maximum(var, 0.0))                 # guard tiny negative from cancellation
    # Note: if no fixation exceeds 0.5, mc == 0 and the result is NaN/Inf,
    # matching the degenerate behavior of the PyTorch module.
    return (ms / mc - mean) / std


def _nss_loss_ref(sal_map, fix):
    sal = sal_map.astype(jnp.float32)
    mask = fix.astype(jnp.float32) > 0.5
    mean = jnp.mean(sal)
    std = jnp.std(sal, ddof=1)
    norm = (sal - mean) / std
    return jnp.sum(jnp.where(mask, norm, 0.0)) / jnp.sum(mask.astype(jnp.float32))


if __name__ == "__main__":
    key = jax.random.PRNGKey(0)
    k1, k2, k3, k4 = jax.random.split(key, 4)

    # NCHW, as the PyTorch module expects.
    B, C, H, W = 2, 4, 16, 16
    sal_map = jax.random.normal(k1, (B, C, H, W), dtype=jnp.float32)
    fix = jax.random.uniform(k2, (B, C, H, W), dtype=jnp.float32)   # ~half > 0.5

    loss = nss_loss(sal_map, fix)
    jax.block_until_ready(loss)
    ref = _nss_loss_ref(sal_map, fix)
    assert jnp.allclose(loss, ref, rtol=1e-5, atol=1e-5), (loss, ref)

    # Ragged shape (exercises the zero-padded tail path).
    sal2 = jax.random.normal(k3, (1, 3, 17, 23), dtype=jnp.float32)
    fix2 = jax.random.uniform(k4, (1, 3, 17, 23), dtype=jnp.float32)
    loss2 = nss_loss(sal2, fix2)
    jax.block_until_ready(loss2)
    ref2 = _nss_loss_ref(sal2, fix2)
    assert jnp.allclose(loss2, ref2, rtol=1e-5, atol=1e-5), (loss2, ref2)

    print("KERNEL_OK")
</pallas_src>

<mosaic_0001>
module attributes {stable_mosaic.version = 11 : i64} {
  func.func @_nss_partials_kernel(%arg0: i32, %arg1: i32, %arg2: memref<8x128xf32, #tpu.memory_space<vmem>>, %arg3: memref<8x128xf32, #tpu.memory_space<vmem>>, %arg4: memref<1x4x8x128xf32, #tpu.memory_space<vmem>>) attributes {dimension_semantics = [#tpu.dimension_semantics<parallel>, #tpu.dimension_semantics<arbitrary>], iteration_bounds = array<i64: 2, 1>, scalar_prefetch = 0 : i64, scratch_operands = 0 : i64, tpu.core_type = #tpu.core_type<tc>, window_params = [{transform_indices = @transform_0, window_bounds = array<i64: 8, 128>}, {transform_indices = @transform_1, window_bounds = array<i64: 8, 128>}, {transform_indices = @transform_2, window_bounds = array<i64: 1, 4, 8, 128>}]} {
    %c0_i32 = arith.constant 0 : i32
    %0 = arith.cmpi eq, %arg1, %c0_i32 : i32
    %1 = arith.extui %0 : i1 to i32
    %c0_i32_0 = arith.constant 0 : i32
    %2 = arith.cmpi ne, %1, %c0_i32_0 : i32
    scf.if %2 {
      %cst_37 = arith.constant 0.000000e+00 : f32
      %41 = vector.broadcast %cst_37 : f32 to vector<1x4x8x128xf32>
      %c0_38 = arith.constant 0 : index
      %c0_39 = arith.constant 0 : index
      %c0_40 = arith.constant 0 : index
      %c0_41 = arith.constant 0 : index
      %42 = vector.load %arg4[%c0_38, %c0_39, %c0_40, %c0_41] : memref<1x4x8x128xf32, #tpu.memory_space<vmem>>, vector<1x4x8x128xf32>
      tpu.vector_store %arg4[%c0_38, %c0_39, %c0_40, %c0_41], %41 {strides = array<i32>} : memref<1x4x8x128xf32, #tpu.memory_space<vmem>>, vector<1x4x8x128xf32>,
    } else {
    }
    %c0 = arith.constant 0 : index
    %c0_1 = arith.constant 0 : index
    %3 = vector.load %arg2[%c0, %c0_1] : memref<8x128xf32, #tpu.memory_space<vmem>>, vector<8x128xf32>
    %c0_2 = arith.constant 0 : index
    %c0_3 = arith.constant 0 : index
    %4 = vector.load %arg3[%c0_2, %c0_3] : memref<8x128xf32, #tpu.memory_space<vmem>>, vector<8x128xf32>
    %cst = arith.constant 5.000000e-01 : f32
    %5 = vector.broadcast %cst : f32 to vector<8x128xf32>
    %6 = arith.cmpf ogt, %4, %5 : vector<8x128xf32>
    %7 = arith.extui %6 : vector<8x128xi1> to vector<8x128xi32>
    %8 = arith.sitofp %7 : vector<8x128xi32> to vector<8x128xf32>
    %9 = vector.shape_cast %3 : vector<8x128xf32> to vector<1x8x128xf32>
    %10 = vector.shape_cast %8 : vector<8x128xf32> to vector<1x8x128xf32>
    %c0_4 = arith.constant 0 : index
    %c0_5 = arith.constant 0 : index
    %c0_6 = arith.constant 0 : index
    %c0_7 = arith.constant 0 : index
    %11 = vector.load %arg4[%c0_4, %c0_5, %c0_6, %c0_7] : memref<1x4x8x128xf32, #tpu.memory_space<vmem>>, vector<1x1x8x128xf32>
    %12 = vector.shape_cast %11 : vector<1x1x8x128xf32> to vector<8x128xf32>
    %cst_8 = arith.constant dense<0.000000e+00> : vector<8x128xf32>
    %13 = vector.multi_reduction <add>, %9, %cst_8 [0] : vector<1x8x128xf32> to vector<8x128xf32>
    %14 = arith.addf %12, %13 : vector<8x128xf32>
    %c0_9 = arith.constant 0 : index
    %c0_10 = arith.constant 0 : index
    %c0_11 = arith.constant 0 : index
    %c0_12 = arith.constant 0 : index
    %15 = vector.load %arg4[%c0_9, %c0_10, %c0_11, %c0_12] : memref<1x4x8x128xf32, #tpu.memory_space<vmem>>, vector<1x1x8x128xf32>
    %16 = vector.shape_cast %15 : vector<1x1x8x128xf32> to vector<8x128xf32>
    %17 = vector.shape_cast %14 : vector<8x128xf32> to vector<1x1x8x128xf32>
    tpu.vector_store %arg4[%c0_9, %c0_10, %c0_11, %c0_12], %17 {strides = array<i32>} : memref<1x4x8x128xf32, #tpu.memory_space<vmem>>, vector<1x1x8x128xf32>,
    %c0_13 = arith.constant 0 : index
    %c1 = arith.constant 1 : index
    %c0_14 = arith.constant 0 : index
    %c0_15 = arith.constant 0 : index
    %18 = vector.load %arg4[%c0_13, %c1, %c0_14, %c0_15] : memref<1x4x8x128xf32, #tpu.memory_space<vmem>>, vector<1x1x8x128xf32>
    %19 = vector.shape_cast %18 : vector<1x1x8x128xf32> to vector<8x128xf32>
    %20 = arith.mulf %9, %9 : vector<1x8x128xf32>
    %cst_16 = arith.constant dense<0.000000e+00> : vector<8x128xf32>
    %21 = vector.multi_reduction <add>, %20, %cst_16 [0] : vector<1x8x128xf32> to vector<8x128xf32>
    %22 = arith.addf %19, %21 : vector<8x128xf32>
    %c0_17 = arith.constant 0 : index
    %c1_18 = arith.constant 1 : index
    %c0_19 = arith.constant 0 : index
    %c0_20 = arith.constant 0 : index
    %23 = vector.load %arg4[%c0_17, %c1_18, %c0_19, %c0_20] : memref<1x4x8x128xf32, #tpu.memory_space<vmem>>, vector<1x1x8x128xf32>
    %24 = vector.shape_cast %23 : vector<1x1x8x128xf32> to vector<8x128xf32>
    %25 = vector.shape_cast %22 : vector<8x128xf32> to vector<1x1x8x128xf32>
    tpu.vector_store %arg4[%c0_17, %c1_18, %c0_19, %c0_20], %25 {strides = array<i32>} : memref<1x4x8x128xf32, #tpu.memory_space<vmem>>, vector<1x1x8x128xf32>,
    %c0_21 = arith.constant 0 : index
    %c2 = arith.constant 2 : index
    %c0_22 = arith.constant 0 : index
    %c0_23 = arith.constant 0 : index
    %26 = vector.load %arg4[%c0_21, %c2, %c0_22, %c0_23] : memref<1x4x8x128xf32, #tpu.memory_space<vmem>>, vector<1x1x8x128xf32>
    %27 = vector.shape_cast %26 : vector<1x1x8x128xf32> to vector<8x128xf32>
    %28 = arith.mulf %9, %10 : vector<1x8x128xf32>
    %cst_24 = arith.constant dense<0.000000e+00> : vector<8x128xf32>
    %29 = vector.multi_reduction <add>, %28, %cst_24 [0] : vector<1x8x128xf32> to vector<8x128xf32>
    %30 = arith.addf %27, %29 : vector<8x128xf32>
    %c0_25 = arith.constant 0 : index
    %c2_26 = arith.constant 2 : index
    %c0_27 = arith.constant 0 : index
    %c0_28 = arith.constant 0 : index
    %31 = vector.load %arg4[%c0_25, %c2_26, %c0_27, %c0_28] : memref<1x4x8x128xf32, #tpu.memory_space<vmem>>, vector<1x1x8x128xf32>
    %32 = vector.shape_cast %31 : vector<1x1x8x128xf32> to vector<8x128xf32>
    %33 = vector.shape_cast %30 : vector<8x128xf32> to vector<1x1x8x128xf32>
    tpu.vector_store %arg4[%c0_25, %c2_26, %c0_27, %c0_28], %33 {strides = array<i32>} : memref<1x4x8x128xf32, #tpu.memory_space<vmem>>, vector<1x1x8x128xf32>,
    %c0_29 = arith.constant 0 : index
    %c3 = arith.constant 3 : index
    %c0_30 = arith.constant 0 : index
    %c0_31 = arith.constant 0 : index
    %34 = vector.load %arg4[%c0_29, %c3, %c0_30, %c0_31] : memref<1x4x8x128xf32, #tpu.memory_space<vmem>>, vector<1x1x8x128xf32>
    %35 = vector.shape_cast %34 : vector<1x1x8x128xf32> to vector<8x128xf32>
    %cst_32 = arith.constant dense<0.000000e+00> : vector<8x128xf32>
    %36 = vector.multi_reduction <add>, %10, %cst_32 [0] : vector<1x8x128xf32> to vector<8x128xf32>
    %37 = arith.addf %35, %36 : vector<8x128xf32>
    %c0_33 = arith.constant 0 : index
    %c3_34 = arith.constant 3 : index
    %c0_35 = arith.constant 0 : index
    %c0_36 = arith.constant 0 : index
    %38 = vector.load %arg4[%c0_33, %c3_34, %c0_35, %c0_36] : memref<1x4x8x128xf32, #tpu.memory_space<vmem>>, vector<1x1x8x128xf32>
    %39 = vector.shape_cast %38 : vector<1x1x8x128xf32> to vector<8x128xf32>
    %40 = vector.shape_cast %37 : vector<8x128xf32> to vector<1x1x8x128xf32>
    tpu.vector_store %arg4[%c0_33, %c3_34, %c0_35, %c0_36], %40 {strides = array<i32>} : memref<1x4x8x128xf32, #tpu.memory_space<vmem>>, vector<1x1x8x128xf32>,
    return
  }
  func.func @transform_0(%arg0: i32, %arg1: i32) -> (i32, i32) {
    %c1_i32 = arith.constant 1 : i32
    %0 = arith.muli %arg0, %c1_i32 : i32
    %1 = arith.addi %0, %arg1 : i32
    %c0_i32 = arith.constant 0 : i32
    %c0_i32_0 = arith.constant 0 : i32
    return %1, %c0_i32 : i32, i32
  }
  func.func @transform_1(%arg0: i32, %arg1: i32) -> (i32, i32) {
    %c1_i32 = arith.constant 1 : i32
    %0 = arith.muli %arg0, %c1_i32 : i32
    %1 = arith.addi %0, %arg1 : i32
    %c0_i32 = arith.constant 0 : i32
    %c0_i32_0 = arith.constant 0 : i32
    return %1, %c0_i32 : i32, i32
  }
  func.func @transform_2(%arg0: i32, %arg1: i32) -> (i32, i32, i32, i32) {
    %c0_i32 = arith.constant 0 : i32
    %c0_i32_0 = arith.constant 0 : i32
    %c0_i32_1 = arith.constant 0 : i32
    %c0_i32_2 = arith.constant 0 : i32
    return %arg0, %c0_i32, %c0_i32_0, %c0_i32_1 : i32, i32, i32, i32
  }
}

</mosaic_0001>

<bundles_post_ra>
// kernel: tpu_custom_call.1
= control target key start
LH: loop header
LB: loop body
LE: loop exit
PB: predicated region body
PF: predicated region fallthrough
CT: control target
= control target key end

     0   :  { %7 = vsyncpa [#allocation3], 0  ;;  %s857_s0 = inlined_call_operand.hbm [shape: f32[16,128], index: 0, kind: input, shape index: {}]   ;;  %s858_s1 = inlined_call_operand.hbm [shape: f32[16,128], index: 1, kind: input, shape index: {}]   ;;  %s859_s2 = inlined_call_operand.hbm [shape: f32[2,4,8,128], index: 2, kind: output, shape index: {}]  }
   0x1   :  { %9 = vsyncpa [#allocation3 + $0x1], 0 }
   0x2   :  { %10 = vsyncpa [#allocation6], 0 }
   0x3   :  { %12 = vsyncpa [#allocation6 + $0x1], 0 }
   0x4   :  { %13 = vsyncpa [#allocation4], 0 }
   0x5   :  { %15 = vsyncpa [#allocation4 + $0x1], 0  ;;  %s634_s9 = smov 0   ;;  %s636_s10 = smov 0  }
   0x6   :  { %s638_s11 = smov 0   ;;  %s640_s12 = smov 0  }
   0x7   :  { %s642_s13 = smov 0   ;;  %s644_s14 = smov 0  }
   0x8 LB: > { %s370_s15 = sadd.s32 4294967295, %s611_s14   ;;  %s371_s16 = sadd.s32 4294967294, %s611_s14   ;;  %s611_s14 = sphi %s644_s14, %s21_s14   ;;  %s607_s13 = sphi %s642_s13, %s879_s13   ;;  %s603_s12 = sphi %s640_s12, %s878_s12   ;;  %s599_s11 = sphi %s638_s11, %s877_s11   ;;  %s595_s10 = sphi %s636_s10, %s876_s10   ;;  %s591_s9 = sphi %s634_s9, %s875_s9  }
   0x9   : > { %s33_s17 = sadd.s32 1, %s607_s13  ;;  %s42_s18 = sadd.s32 1, %s599_s11 }
   0xa   : > { %p35_p0 = scmp.ge.s32.totalorder %s33_s17, 2  ;;  %p49_p1 = scmp.ne.s32.totalorder %s599_s11, %s595_s10 }
   0xb   : > { %p50_p2 = scmp.eq.s32.totalorder %s611_s14, 0  ;;  %p55_p3 = scmp.ne.s32.totalorder %s595_s10, %s591_s9 }
   0xc   : > { %s881_s17 = smov (%p35_p0, %s33_s17), 0  ;;  %p56_p5 = scmp.eq.s32.totalorder %s370_s15, 0 }
   0xd   : > { %p675_p4 = por %p50_p2, %p49_p1  ;;  %s39_s20 = ssub.s32 %s607_s13, %s881_s17 }
   0xe   : > { %p107_p6 = scmp.eq.s32.totalorder %s370_s15, 1  ;;  %p40_p7 = scmp.eq.s32.totalorder %s39_s20, 0 }
   0xf   : > { %p681_p8 = por %p56_p5, %p55_p3  ;;  %p113_p10 = scmp.eq.s32.totalorder %s371_s16, 1 }
  0x10   : > { %p685_p9 = por %p107_p6, %p49_p1  ;;  %p412_p13 = scmp.lt.s32.totalorder %s611_s14, 2 }
  0x11   : > { %s863_s21 = scalar_select %p681_p8, 1, 0 }
  0x12   : > { %s864_s22 = scalar_select %p685_p9, 1, 0 }
  0x13   : > { %s690_s23 = scalar_select %p40_p7, %s599_s11, %s42_s18  }
  0x14   : > { %p692_p11 = por %p113_p10, %p55_p3  ;;  %s699_s25 = sand.u32 1, %s599_s11  }
  0x15   : > { %s374_s26 = sshll.u32 %s699_s25, 3  ;;  %s375_s27 = sshll.u32 %s607_s13, 7 }
  0x16   : > { %s865_s24 = scalar_select %p692_p11, 1, 0 }
  0x17   : > { %s708_s30 = scalar_lea.hbm %s857_s0, %s375_s27  ;;  %s137_s3 = scalar_lea.vmem [#allocation2], %s374_s26 }
  0x18   : > { %s145_s4 = sshll.u32 %s137_s3, 4  ;;  %p716_p0 = pnand %p412_p13, %p675_p4  ;;  %s712_s4 = int_to_ptr.vmem [resolvable:$true] %s145_s4 }
  0x19   : > { %s134_s6 = scalar_lea.sflag [#allocation3], %s699_s25  ;;  %s465_s7 = scalar_lea.hbm %s708_s30, 128 }
  0x1a   : > { %p466_p3 = scmp.ne.s32.totalorder %s708_s30, %s465_s7  ;;  %p467_p5 = pneg %p716_p0 }
  0x1b   : > { %s470_s16 = scalar_lea.hbm %s857_s0, 256  ;;  %p471_p4 = scmp.lt.u32.totalorder %s708_s30, %s857_s0 }
  0x1c   : > { %p468_p6 = pnand %p467_p5, %p466_p3  ;;  %p472_p10 = scmp.lt.u32.totalorder %s470_s16, %s465_s7 }
  0x1d   : > { %p474_p12 = scmp.lt.u32.totalorder %s465_s7, %s708_s30 }
  0x1e   : > { %p469_p7 = pneg %p468_p6  ;;  %p473_p13 = por %p472_p10, %p471_p4 }
  0x20   : > { %p475_p1 = por %p474_p12, %p473_p13 }
  0x22   : > { %p476_p2 = pnand %p475_p1, %p469_p7 }
  0x24   : > { %479 = shalt.err (!%p476_p2)
}
  0x25   : > { %s480_s20 = scalar_lea.vmem %s712_s4, 128  ;;  %s613_s28 = smov [#allocation2]  }
  0x26   : > { %p481_p3 = scmp.ne.s32.totalorder %s712_s4, %s480_s20  ;;  %s485_s29 = sshll.u32 %s613_s28, 4  ;;  %s486_s29 = int_to_ptr.vmem [resolvable:$false] %s485_s29 }
  0x27   : > { %s487_s3 = scalar_lea.vmem %s486_s29, 256  ;;  %p488_p9 = scmp.lt.s32.totalorder %s712_s4, %s486_s29 }
  0x28   : > { %p483_p6 = pnand %p481_p3, %p467_p5  ;;  %p489_p4 = scmp.lt.s32.totalorder %s487_s3, %s480_s20 }
  0x2a   : > { %p484_p11 = pneg %p483_p6  ;;  %p490_p10 = por %p489_p4, %p488_p9 }
  0x2c   : > { %p491_p12 = pnand %p490_p10, %p484_p11 }
  0x2e   : > { %494 = shalt.err (!%p491_p12)
}
  0x2f   : > { %404 = dma.hbm_to_vmem [thread:$0]  (!%p716_p0), %s708_s30, 128, %s712_s4, %s134_s6  }
  0x30   : > { %p867_p1 = scmp.lt.s32.totalorder %s611_s14, 3  ;;  %p868_p2 = scmp.ge.s32.totalorder %s611_s14, 1 }
  0x31   : > { %s761_s16 = scalar_lea.hbm %s858_s1, %s375_s27  ;;  %s156_s18 = scalar_lea.vmem [#allocation5], %s374_s26 }
  0x32   : > { %p752_p7 = pnand %p868_p2, %p867_p1  ;;  %s164_s19 = sshll.u32 %s156_s18, 4  ;;  %s165_s19 = int_to_ptr.vmem [resolvable:$true] %s164_s19 }
  0x33   : > { %s153_s30 = scalar_lea.sflag [#allocation6], %s699_s25  ;;  %s495_s4 = scalar_lea.hbm %s761_s16, 128 }
  0x34   : > { %s869_s7 = scalar_select %p752_p7, 1, 0 }
  0x35   : > { %p496_p9 = scmp.ne.s32.totalorder %s761_s16, %s495_s4  ;;  %s500_s27 = scalar_lea.hbm %s858_s1, 256 }
  0x36   : > { %p501_p3 = scmp.lt.u32.totalorder %s761_s16, %s858_s1  ;;  %p502_p6 = scmp.lt.u32.totalorder %s500_s27, %s495_s4 }
  0x37   : > { %p498_p11 = pnand %p496_p9, %p467_p5  ;;  %p504_p10 = scmp.lt.u32.totalorder %s495_s4, %s761_s16 }
  0x38   : > { %p503_p4 = por %p502_p6, %p501_p3 }
  0x39   : > { %p499_p13 = pneg %p498_p11 }
  0x3a   : > { %p505_p12 = por %p504_p10, %p503_p4 }
  0x3c   : > { %p506_p1 = pnand %p505_p12, %p499_p13 }
  0x3e   : > { %509 = shalt.err (!%p506_p1)
}
  0x3f   : > { %s510_s25 = scalar_lea.vmem %s165_s19, 128  ;;  %s614_s26 = smov [#allocation5]  }
  0x40   : > { %p511_p2 = scmp.ne.s32.totalorder %s165_s19, %s510_s25  ;;  %s515_s3 = sshll.u32 %s614_s26, 4  ;;  %s516_s3 = int_to_ptr.vmem [resolvable:$false] %s515_s3 }
  0x41   : > { %s517_s8 = scalar_lea.vmem %s516_s3, 256  ;;  %p518_p8 = scmp.lt.s32.totalorder %s165_s19, %s516_s3 }
  0x42   : > { %p513_p9 = pnand %p511_p2, %p467_p5  ;;  %p519_p7 = scmp.lt.s32.totalorder %s517_s8, %s510_s25 }
  0x44   : > { %p514_p11 = pneg %p513_p9  ;;  %p520_p3 = por %p519_p7, %p518_p8 }
  0x46   : > { %p521_p6 = pnand %p520_p3, %p514_p11 }
  0x48   : > { %524 = shalt.err (!%p521_p6)
}
  0x49   : > { %407 = dma.hbm_to_vmem [thread:$0]  (!%p716_p0), %s761_s16, 128, %s165_s19, %s153_s30  }
  0x4a   : > { %p870_p13 = scmp.ne.s32.totalorder %s869_s7, 0 }
  0x4b   : > { %s788_s15 = sand.u32 (!%p870_p13), 1, %s595_s10   ;;  %p871_p5 = scmp.ne.s32.totalorder (!%p870_p13), %s863_s21, 0 }
  0x4c   : > { %173 = sbr.rel (%p870_p13) target bundleno = 113 (0x71), region = 28  ;;  %s379_s18 = sshll.u32 (!%p870_p13), %s788_s15, 3 }
  0x4d   : > { %s176_s4 = scalar_lea.sflag (!%p870_p13), [#allocation3], %s788_s15  ;;  %s179_s6 = scalar_lea.vmem (!%p870_p13), [#allocation2], %s379_s18 }
  0x53   : > { %578 = dma.done.wait (%p871_p5), %s176_s4, 128  }
  0x54   : > { %580 = vsyncadd (%p871_p5), %s176_s4, 4294967168  ;;  %s185_s5 = scalar_lea.sflag [#allocation6], %s788_s15  ;;  %s188_s16 = scalar_lea.vmem [#allocation5], %s379_s18 }
  0x55   : > { %582 = dma.done.wait (%p871_p5), %s185_s5, 128  }
  0x56   : > { %584 = vsyncadd (%p871_p5), %s185_s5, 4294967168  ;;  %s381_s7 = sshll.u32 %s788_s15, 5  ;;  %v224_v0 = vld [vmem:[%s179_s6] sm:$0xff]  ;;  %v225_v1 = vld [vmem:[%s188_s16] sm:$0xff]  ;;  %s394_s19 = sshll.u32 %s603_s12, 9  ;;  %v615_v3 = vmov 0.0  }
  0x57   : > { %v235_v2 = vmul.f32 %v224_v0, %v224_v0  ;;  %vm226_vm0 = vcmp.gt.f32.partialorder %v225_v1, 0.5  ;;  %s213_s30 = scalar_lea.vmem [#allocation7], %s381_s7  ;;  %s806_s21 = scalar_lea.hbm %s859_s2, %s394_s19 }
  0x58   : > { %s264_s20 = sshll.u32 %s213_s30, 4  ;;  %v382_v4 = vsel %vm226_vm0, 1.0, %v615_v3  ;;  %232 = vst [vmem:[%s213_s30] sm:$0xff] %v224_v0  ;;  %s251_s12 = scalar_lea.sflag [#allocation4], %s788_s15  ;;  %s808_s20 = int_to_ptr.vmem [resolvable:$true] %s264_s20 }
  0x59   : > { %v241_v5 = vmul.f32 %v382_v4, %v224_v0  ;;  %384 = vst [vmem:[%s213_s30 + $0x8] sm:$0xff] %v235_v2  ;;  %388 = vst [vmem:[%s213_s30 + $0x18] sm:$0xff] %v382_v4  ;;  %s525_s29 = scalar_lea.vmem %s808_s20, 512  ;;  %p872_p0 = scmp.ne.s32.totalorder %s864_s22, 0 }
  0x5a   : > { %p526_p8 = scmp.ne.s32.totalorder %s808_s20, %s525_s29  ;;  %s616_s25 = smov [#allocation7]  }
  0x5b   : > { %386 = vst [vmem:[%s213_s30 + $0x10] sm:$0xff] %v241_v5  ;;  %s529_s26 = sshll.u32 %s616_s25, 4  ;;  %s530_s26 = int_to_ptr.vmem [resolvable:$false] %s529_s26 }
  0x5c   : > { %p527_p7 = pnand %p526_p8, %p872_p0  ;;  %s531_s3 = scalar_lea.vmem %s530_s26, 1024 }
  0x5d   : > { %p532_p10 = scmp.lt.s32.totalorder %s808_s20, %s530_s26  ;;  %p533_p12 = scmp.lt.s32.totalorder %s531_s3, %s525_s29 }
  0x5e   : > { %p528_p4 = pneg %p527_p7 }
  0x5f   : > { %p534_p1 = por %p533_p12, %p532_p10 }
  0x61   : > { %p535_p2 = pnand %p534_p1, %p528_p4 }
  0x63   : > { %538 = shalt.err (!%p535_p2)
}
  0x64   : > { %s539_s8 = scalar_lea.hbm %s806_s21, 512  ;;  %s543_s6 = scalar_lea.hbm %s859_s2, 1024 }
  0x65   : > { %p540_p9 = scmp.ne.s32.totalorder %s806_s21, %s539_s8  ;;  %p544_p6 = scmp.lt.u32.totalorder %s806_s21, %s859_s2 }
  0x66   : > { %p545_p13 = scmp.lt.u32.totalorder %s543_s6, %s539_s8  ;;  %p547_p8 = scmp.lt.u32.totalorder %s539_s8, %s806_s21 }
  0x67   : > { %p541_p11 = pnand %p540_p9, %p872_p0 }
  0x68   : > { %p546_p5 = por %p545_p13, %p544_p6 }
  0x69   : > { %p542_p3 = pneg %p541_p11 }
  0x6a   : > { %p548_p7 = por %p547_p8, %p546_p5 }
  0x6c   : > { %p549_p4 = pnand %p548_p7, %p542_p3 }
  0x6e   : > { %552 = shalt.err (!%p549_p4)
}
  0x6f   : > { %s617_s7 = smov 128   ;;  %s618_s19 = smov 8  }
  0x70   : > { %399 = dma.vmem_to_hbm [thread:$0]  (%p872_p0), %s808_s20, 512, %s806_s21, %s251_s12, %s617_s7, %s617_s7, %s618_s19  }
  0x71 PF: > { %s279_s30 = sand.u32 1, %s591_s9   ;;  %p873_p10 = scmp.ne.s32.totalorder %s865_s24, 0 }
  0x72   : > { %p874_p12 = scmp.ge.s32.totalorder %s611_s14, 2  ;;  %s280_s27 = scalar_lea.sflag [#allocation4], %s279_s30 }
  0x74   : > { %p409_p1 = pnand %p874_p12, %p873_p10 }
  0x76   : > { %586 = dma.done.wait (!%p409_p1), %s280_s27, 512  }
  0x77   : > { %588 = vsyncadd (!%p409_p1), %s280_s27, 4294966784  ;;  %s21_s14 = sadd.s32 1, %s611_s14   ;;  %s875_s9 = smov %s595_s10 }
  0x78   : > { %p18_p2 = scmp.ge.s32.totalorder %s21_s14, 4   ;;  %s876_s10 = smov %s599_s11 }
  0x79   : > { %s877_s11 = smov %s690_s23  ;;  %s878_s12 = smov %s607_s13 }
  0x7a   : > { %s879_s13 = smov %s881_s17  ;;  %20 = sbr.rel (!%p18_p2) target bundleno = 8 (0x8), region = 93 }
  0x81   :  { %285 = vsyncpa [#allocation3], 1 }
  0x82   :  { %287 = vsyncpa [#allocation3 + $0x1], 1 }
  0x83   :  { %288 = vsyncpa [#allocation6], 1 }
  0x84   :  { %290 = vsyncpa [#allocation6 + $0x1], 1 }
  0x85   :  { %291 = vsyncpa [#allocation4], 1 }
  0x86   :  { %293 = vsyncpa [#allocation4 + $0x1], 1 }

</bundles_post_ra>
